<compile_context>
chip_gen: v5e
topology: v5e:2x2
jax: 0.10.0
libtpu: 0.0.40
codegen_flags: <defaults>
</compile_context>

<pallas_src>
import jax
import jax.numpy as jnp
from jax.experimental import pallas as pl
from jax.experimental.pallas import tpu as pltpu

_LANES = 128
_TARGET_BLOCK_BYTES = 2 * 1024 * 1024  # ~2 MiB blocks: 4x double-buffered ~ 8 MiB


def _identity_copy_kernel(x_ref, o_ref):
    # Pure pass-through copy of the current tile.
    o_ref[...] = x_ref[...]


def _sublane_multiple(dtype) -> int:
    # Sublane tiling multiple: 8 for 32-bit, 16 for 16-bit, 32 for 8-bit dtypes.
    itemsize = jnp.dtype(dtype).itemsize
    return max(8, 32 // itemsize)


def _copy_lane_dense(x2: jax.Array, donate: bool) -> jax.Array:
    """Tiled (rows, 128) copy through VMEM; rows may be any positive size."""
    rows, lanes = x2.shape
    assert lanes == _LANES
    dtype = x2.dtype
    itemsize = jnp.dtype(dtype).itemsize
    sub_mult = _sublane_multiple(dtype)

    max_rows = max(sub_mult, _TARGET_BLOCK_BYTES // (_LANES * itemsize))
    if rows <= max_rows:
        # Small array (<~2 MiB): single whole-array block, grid of 1.
        block_rows = rows
    else:
        # Large array: ~2 MiB blocks (multiple of the sublane tile) -> always
        # >= 2 grid steps, lets v7x shard the copy across its two TensorCores.
        block_rows = (max_rows // sub_mult) * sub_mult

    grid = (pl.cdiv(rows, block_rows),)
    extra = {}
    if donate:
        # Only alias when the caller actually donates x; otherwise XLA inserts
        # a defensive copy and total HBM traffic doubles.
        extra["input_output_aliases"] = {0: 0}

    return pl.pallas_call(
        _identity_copy_kernel,
        out_shape=jax.ShapeDtypeStruct((rows, _LANES), dtype),
        grid=grid,
        in_specs=[pl.BlockSpec((block_rows, _LANES), lambda i: (i, 0))],
        out_specs=pl.BlockSpec((block_rows, _LANES), lambda i: (i, 0)),
        compiler_params=pltpu.CompilerParams(
            dimension_semantics=("parallel",)),
        cost_estimate=pl.CostEstimate(
            flops=0,
            transcendentals=0,
            bytes_accessed=2 * rows * _LANES * itemsize),
        **extra,
    )(x2)


def identity_map(x: jax.Array, *args, materialize: bool = False,
                 donate: bool = False, **kwargs) -> jax.Array:
    """Pallas equivalent of IdentityMap.forward(x, *args, **kwargs) -> x.

    By default this is a true identity (returns x, free under jit).  Set
    `materialize=True` to force an explicit materialized copy via the Pallas
    kernel; set `donate=True` only if the caller donates x (jit donate_argnums),
    in which case the copy is aliased onto the input buffer.
    """
    if not materialize:
        return x

    orig_shape = x.shape
    n = x.size
    if n == 0:
        return x

    if n % _LANES == 0:
        # Lane-dense path: contiguous flatten to (rows, 128) is a bitcast-level
        # reshape; every store is a full unmasked 128-lane vst.
        rows = n // _LANES
        out2 = _copy_lane_dense(x.reshape(rows, _LANES), donate=donate)
        return out2.reshape(orig_shape)

    # Fallback: pad the flattened array up to a multiple of 128 lanes, reuse
    # the tiled lane-dense path, then slice the padding back off.
    flat = x.reshape(-1)
    pad = (-n) % _LANES
    flat_p = jnp.pad(flat, (0, pad))
    rows = flat_p.size // _LANES
    out_p = _copy_lane_dense(flat_p.reshape(rows, _LANES), donate=False)
    return out_p.reshape(-1)[:n].reshape(orig_shape)


# IdentityMap.config property equivalent (no parameters to initialize).
IDENTITY_MAP_CONFIG = {"mm_projector_type": "identity"}


if __name__ == "__main__":
    key = jax.random.PRNGKey(0)

    # Small shape consistent with a projector input: (batch, seq, hidden).
    B, S, H = 2, 8, 32
    x = jax.random.normal(key, (B, S, H), dtype=jnp.float32)

    # Default path: true identity, no kernel, no copy.
    y_free = identity_map(x)
    jax.block_until_ready(y_free)
    assert y_free.shape == x.shape and y_free.dtype == x.dtype
    assert jnp.array_equal(y_free, x)

    # Materialized copy path (exercises the Pallas kernel, single block).
    y = identity_map(x, materialize=True)
    jax.block_until_ready(y)
    assert y.shape == x.shape and y.dtype == x.dtype
    assert jnp.array_equal(y, x), "IdentityMap must return its input unchanged"

    # Larger input (~4 MiB) to exercise the multi-block parallel grid.
    x_big = jax.random.normal(jax.random.PRNGKey(2), (4, 256, 1024),
                              dtype=jnp.float32)
    y_big = identity_map(x_big, materialize=True)
    jax.block_until_ready(y_big)
    assert jnp.array_equal(y_big, x_big)

    # Non-128-divisible fallback path (padded lane-dense copy).
    x_odd = jax.random.normal(jax.random.PRNGKey(1), (3, 5, 7),
                              dtype=jnp.float32)
    y_odd = identity_map(x_odd, materialize=True)
    jax.block_until_ready(y_odd)
    assert y_odd.shape == x_odd.shape
    assert jnp.array_equal(y_odd, x_odd)

    print("KERNEL_OK")
</pallas_src>

<mosaic_0001>
module attributes {stable_mosaic.version = 11 : i64} {
  func.func @_identity_copy_kernel(%arg0: i32, %arg1: memref<4x128xf32, #tpu.memory_space<vmem>>, %arg2: memref<4x128xf32, #tpu.memory_space<vmem>>) attributes {dimension_semantics = [#tpu.dimension_semantics<parallel>], iteration_bounds = array<i64: 1>, scalar_prefetch = 0 : i64, scratch_operands = 0 : i64, tpu.core_type = #tpu.core_type<tc>, window_params = [{transform_indices = @transform_0, window_bounds = array<i64: 4, 128>}, {transform_indices = @transform_1, window_bounds = array<i64: 4, 128>}]} {
    %c0 = arith.constant 0 : index
    %c0_0 = arith.constant 0 : index
    %0 = vector.load %arg1[%c0, %c0_0] : memref<4x128xf32, #tpu.memory_space<vmem>>, vector<4x128xf32>
    %c0_1 = arith.constant 0 : index
    %c0_2 = arith.constant 0 : index
    %1 = vector.load %arg2[%c0_1, %c0_2] : memref<4x128xf32, #tpu.memory_space<vmem>>, vector<4x128xf32>
    tpu.vector_store %arg2[%c0_1, %c0_2], %0 {strides = array<i32>} : memref<4x128xf32, #tpu.memory_space<vmem>>, vector<4x128xf32>,
    return
  }
  func.func @transform_0(%arg0: i32) -> (i32, i32) {
    %c0_i32 = arith.constant 0 : i32
    %c0_i32_0 = arith.constant 0 : i32
    return %arg0, %c0_i32 : i32, i32
  }
  func.func @transform_1(%arg0: i32) -> (i32, i32) {
    %c0_i32 = arith.constant 0 : i32
    %c0_i32_0 = arith.constant 0 : i32
    return %arg0, %c0_i32 : i32, i32
  }
}

</mosaic_0001>

<bundles_post_ra>
// kernel: tpu_custom_call.1
= control target key start
LH: loop header
LB: loop body
LE: loop exit
PB: predicated region body
PF: predicated region fallthrough
CT: control target
= control target key end

     0   :  { %6 = vsyncpa [#allocation3], 0  ;;  %s114_s0 = inlined_call_operand.hbm [shape: f32[4,128], index: 0, kind: input, shape index: {}]   ;;  %s115_s1 = inlined_call_operand.hbm [shape: f32[4,128], index: 1, kind: output, shape index: {}]  }
   0x1   :  { %7 = vsyncpa [#allocation4], 0  ;;  %s13_s8 = sshll.u32 %s114_s0, 4  ;;  %s96_s9 = smov [#allocation2]   ;;  %s14_s8 = int_to_ptr.hbm [resolvable:$true] %s13_s8 }
   0x2   :  { %s15_s10 = sshll.u32 %s96_s9, 4  ;;  %s16_s10 = int_to_ptr.vmem [resolvable:$true] %s15_s10 }
   0x3   :  { %18 = dma.hbm_to_vmem [thread:$0]  %s14_s8, 64, %s16_s10, [#allocation3]  }
   0x4   :  { %92 = dma.done.wait [#allocation3], 64  }
   0x5   :  { %93 = vsyncadd [#allocation3], 4294967232  ;;  %s97_s11 = smov [#allocation5]   ;;  %s32_s15 = sshll.u32 %s115_s1, 4  ;;  %v23_v0 = vld [vmem:[#allocation2] sm:$0xf]  ;;  %s33_s15 = int_to_ptr.hbm [resolvable:$true] %s32_s15 }
   0x6   :  { %s30_s12 = sshll.u32 %s97_s11, 4  ;;  %24 = vst [vmem:[#allocation5] sm:$0xf] %v23_v0  ;;  %s31_s12 = int_to_ptr.vmem [resolvable:$true] %s30_s12 }
   0x7   :  { %35 = dma.vmem_to_hbm [thread:$0]  %s31_s12, 64, %s33_s15, [#allocation4]  }
   0x8   :  { %94 = dma.done.wait [#allocation4], 64  }
   0x9   :  { %95 = vsyncadd [#allocation4], 4294967232 }
   0xa   :  { %40 = vsyncpa [#allocation3], 1 }
   0xb   :  { %41 = vsyncpa [#allocation4], 1 }

</bundles_post_ra>
